<compile_context>
chip_gen: v7x
topology: tpu7x:2x2x1
jax: 0.10.0
libtpu: 0.0.40
codegen_flags: <defaults>
</compile_context>

<pallas_src>
import jax
import jax.numpy as jnp
from jax.experimental import pallas as pl
from jax.experimental.pallas import tpu as pltpu


def _avg_readout_kernel(inv_ref, seq_ref, msk_ref, o_ref, acc_ref):
    """Grid = (d tiles [parallel], n tiles [reduction, last])."""
    n_idx = pl.program_id(1)

    @pl.when(n_idx == 0)
    def _():
        acc_ref[...] = jnp.zeros_like(acc_ref)

    seq = seq_ref[...].astype(jnp.float32)     # (B, TN, TD)
    msk = msk_ref[...].astype(jnp.float32)     # (B, TN, 1) -> lane broadcast
    acc_ref[...] += jnp.sum(seq * msk, axis=1)  # masked node-sum, f32 accumulate

    @pl.when(n_idx == pl.num_programs(1) - 1)
    def _():
        # Apply the scalar 1/denominator (SMEM) in the finalize step.
        o_ref[...] = (acc_ref[...] * inv_ref[0]).astype(o_ref.dtype)


def _choose_tile(dim, multiple, preferred):
    """Largest tile <= preferred that is a multiple of `multiple` and evenly
    divides dim (avoids ragged reduction blocks). Falls back to full extent
    (always a legal block shape) when dim itself isn't a multiple."""
    if dim % multiple != 0:
        return dim
    t = min(preferred, dim)
    t = (t // multiple) * multiple
    while dim % t != 0:
        t -= multiple
    return t


def avg_readout(seq, msk=None):
    """seq: [B, N, D]; msk: [B, N] or None. Returns [B, D]."""
    B, N, D = seq.shape

    if msk is None:
        # mean over nodes == masked sum with all-ones mask divided by N
        msk_f = jnp.ones((B, N), dtype=jnp.float32)
        denom = jnp.float32(N)
    else:
        msk_f = msk.astype(jnp.float32)
        denom = jnp.sum(msk_f)            # scalar sum over the WHOLE mask (PyTorch semantics)

    inv_scale = jnp.reshape(1.0 / denom, (1,)).astype(jnp.float32)
    msk3 = msk_f.reshape(B, N, 1)         # broadcast over features inside the kernel

    TN = _choose_tile(N, 8, 512)          # node tile (sublane axis)
    TD = _choose_tile(D, 128, 512)        # feature tile (lane axis, 128-multiple)
    d_tiles = D // TD
    n_tiles = N // TN

    return pl.pallas_call(
        _avg_readout_kernel,
        out_shape=jax.ShapeDtypeStruct((B, D), seq.dtype),
        grid=(d_tiles, n_tiles),
        in_specs=[
            # scalar 1/denominator, whole array in SMEM
            pl.BlockSpec(memory_space=pltpu.MemorySpace.SMEM),
            # seq tile: (B, TN, TD); weight/bias-style residency not needed,
            # each (d, n) step touches its own tile and gets double-buffered.
            pl.BlockSpec((B, TN, TD), lambda d, n: (0, n, d)),
            # mask tile: (B, TN, 1), constant across the feature axis
            pl.BlockSpec((B, TN, 1), lambda d, n: (0, n, 0)),
        ],
        # Output block resident across the reduction axis (index_map ignores n).
        out_specs=pl.BlockSpec((B, TD), lambda d, n: (0, d)),
        scratch_shapes=[pltpu.VMEM((B, TD), jnp.float32)],
        compiler_params=pltpu.CompilerParams(
            # feature axis independent (megacore-shardable on v7x),
            # node axis is the sequential reduction -> last, "arbitrary".
            dimension_semantics=("parallel", "arbitrary"),
        ),
    )(inv_scale, seq, msk3)


if __name__ == "__main__":
    key = jax.random.PRNGKey(0)
    k_seq, k_msk = jax.random.split(key)

    B, N, D = 2, 16, 128   # small, but lane-dense feature dim (multiple of 128)

    seq = jax.random.normal(k_seq, (B, N, D), dtype=jnp.float32)
    msk = (jax.random.uniform(k_msk, (B, N)) > 0.4).astype(jnp.float32)
    msk = msk.at[0, 0].set(1.0)   # guarantee a non-zero denominator

    # Masked path
    out_masked = jax.block_until_ready(avg_readout(seq, msk))
    # msk=None path (plain mean over nodes)
    out_mean = jax.block_until_ready(avg_readout(seq, None))

    # Pure-JAX references with the exact PyTorch semantics.
    ref_masked = jnp.sum(seq * msk[:, :, None], axis=1) / jnp.sum(msk)
    ref_mean = jnp.mean(seq, axis=1)

    assert out_masked.shape == (B, D)
    assert out_mean.shape == (B, D)
    assert jnp.allclose(out_masked, ref_masked, atol=1e-5, rtol=1e-5)
    assert jnp.allclose(out_mean, ref_mean, atol=1e-5, rtol=1e-5)

    print("KERNEL_OK")
</pallas_src>

<mosaic_0001>
module attributes {stable_mosaic.version = 11 : i64} {
  func.func @_avg_readout_kernel(%arg0: i32, %arg1: i32, %arg2: memref<1xf32, #tpu.memory_space<smem>>, %arg3: memref<2x16x128xf32, #tpu.memory_space<vmem>>, %arg4: memref<2x16x1xf32, #tpu.memory_space<vmem>>, %arg5: memref<2x128xf32, #tpu.memory_space<vmem>>, %arg6: memref<2x128xf32, #tpu.memory_space<vmem>>) attributes {dimension_semantics = [#tpu.dimension_semantics<parallel>, #tpu.dimension_semantics<arbitrary>], iteration_bounds = array<i64: 1, 1>, scalar_prefetch = 0 : i64, scratch_operands = 1 : i64, tpu.core_type = #tpu.core_type<tc>, window_params = [{transform_indices = @transform_0, window_bounds = array<i64: 1>}, {transform_indices = @transform_1, window_bounds = array<i64: 2, 16, 128>}, {transform_indices = @transform_2, window_bounds = array<i64: 2, 16, 1>}, {transform_indices = @transform_3, window_bounds = array<i64: 2, 128>}]} {
    %c0_i32 = arith.constant 0 : i32
    %0 = arith.cmpi eq, %arg1, %c0_i32 : i32
    %1 = arith.extui %0 : i1 to i32
    %c0_i32_0 = arith.constant 0 : i32
    %2 = arith.cmpi ne, %1, %c0_i32_0 : i32
    scf.if %2 {
      %cst_12 = arith.constant 0.000000e+00 : f32
      %14 = vector.broadcast %cst_12 : f32 to vector<2x128xf32>
      %c0_13 = arith.constant 0 : index
      %c0_14 = arith.constant 0 : index
      %15 = vector.load %arg6[%c0_13, %c0_14] : memref<2x128xf32, #tpu.memory_space<vmem>>, vector<2x128xf32>
      tpu.vector_store %arg6[%c0_13, %c0_14], %14 {strides = array<i32>} : memref<2x128xf32, #tpu.memory_space<vmem>>, vector<2x128xf32>,
    } else {
    }
    %c0 = arith.constant 0 : index
    %c0_1 = arith.constant 0 : index
    %c0_2 = arith.constant 0 : index
    %3 = vector.load %arg3[%c0, %c0_1, %c0_2] : memref<2x16x128xf32, #tpu.memory_space<vmem>>, vector<2x16x128xf32>
    %c0_3 = arith.constant 0 : index
    %c0_4 = arith.constant 0 : index
    %c0_5 = arith.constant 0 : index
    %4 = vector.load %arg4[%c0_3, %c0_4, %c0_5] : memref<2x16x1xf32, #tpu.memory_space<vmem>>, vector<2x16x1xf32>
    %c0_6 = arith.constant 0 : index
    %c0_7 = arith.constant 0 : index
    %5 = vector.load %arg6[%c0_6, %c0_7] : memref<2x128xf32, #tpu.memory_space<vmem>>, vector<2x128xf32>
    %6 = vector.broadcast %4 : vector<2x16x1xf32> to vector<2x16x128xf32>
    %7 = arith.mulf %3, %6 : vector<2x16x128xf32>
    %cst = arith.constant dense<0.000000e+00> : vector<2x128xf32>
    %8 = vector.multi_reduction <add>, %7, %cst [1] : vector<2x16x128xf32> to vector<2x128xf32>
    %9 = arith.addf %5, %8 : vector<2x128xf32>
    %c0_8 = arith.constant 0 : index
    %c0_9 = arith.constant 0 : index
    %10 = vector.load %arg6[%c0_8, %c0_9] : memref<2x128xf32, #tpu.memory_space<vmem>>, vector<2x128xf32>
    tpu.vector_store %arg6[%c0_8, %c0_9], %9 {strides = array<i32>} : memref<2x128xf32, #tpu.memory_space<vmem>>, vector<2x128xf32>,
    %c0_i32_10 = arith.constant 0 : i32
    %11 = arith.cmpi eq, %arg1, %c0_i32_10 : i32
    %12 = arith.extui %11 : i1 to i32
    %c0_i32_11 = arith.constant 0 : i32
    %13 = arith.cmpi ne, %12, %c0_i32_11 : i32
    scf.if %13 {
      %c0_12 = arith.constant 0 : index
      %c0_13 = arith.constant 0 : index
      %14 = vector.load %arg6[%c0_12, %c0_13] : memref<2x128xf32, #tpu.memory_space<vmem>>, vector<2x128xf32>
      %c0_14 = arith.constant 0 : index
      %15 = memref.load %arg2[%c0_14] : memref<1xf32, #tpu.memory_space<smem>>
      %16 = vector.broadcast %15 : f32 to vector<2x128xf32>
      %17 = arith.mulf %14, %16 : vector<2x128xf32>
      %c0_15 = arith.constant 0 : index
      %c0_16 = arith.constant 0 : index
      %18 = vector.load %arg5[%c0_15, %c0_16] : memref<2x128xf32, #tpu.memory_space<vmem>>, vector<2x128xf32>
      tpu.vector_store %arg5[%c0_15, %c0_16], %17 {strides = array<i32>} : memref<2x128xf32, #tpu.memory_space<vmem>>, vector<2x128xf32>,
    } else {
    }
    return
  }
  func.func @transform_0(%arg0: i32, %arg1: i32) -> i32 {
    %c0_i32 = arith.constant 0 : i32
    %c0_i32_0 = arith.constant 0 : i32
    return %c0_i32 : i32
  }
  func.func @transform_1(%arg0: i32, %arg1: i32) -> (i32, i32, i32) {
    %c0_i32 = arith.constant 0 : i32
    %c0_i32_0 = arith.constant 0 : i32
    return %c0_i32, %arg1, %arg0 : i32, i32, i32
  }
  func.func @transform_2(%arg0: i32, %arg1: i32) -> (i32, i32, i32) {
    %c0_i32 = arith.constant 0 : i32
    %c0_i32_0 = arith.constant 0 : i32
    %c0_i32_1 = arith.constant 0 : i32
    return %c0_i32, %arg1, %c0_i32_0 : i32, i32, i32
  }
  func.func @transform_3(%arg0: i32, %arg1: i32) -> (i32, i32) {
    %c0_i32 = arith.constant 0 : i32
    %c0_i32_0 = arith.constant 0 : i32
    return %c0_i32, %arg0 : i32, i32
  }
}

</mosaic_0001>

<bundles_post_ra>
// kernel: tpu_custom_call.1
= control target key start
LH: loop header
LB: loop body
LE: loop exit
PB: predicated region body
PF: predicated region fallthrough
CT: control target
= control target key end

     0   :  { %v126_v2 = vmov 0   ;;  %s188_s0 = inlined_call_operand.<no memory space> [shape: f32[1], index: 0, kind: input, shape index: {}]   ;;  %s189_s1 = inlined_call_operand.vmem [shape: f32[2,16,128], index: 1, kind: input, shape index: {}]   ;;  %s190_s2 = inlined_call_operand.vmem [shape: f32[2,16,1], index: 2, kind: input, shape index: {}]   ;;  %s191_s3 = inlined_call_operand.hbm [shape: f32[2,128], index: 3, kind: output, shape index: {}]  }
   0x1   :  { %v27_v0 = vld [vmem:[%s190_s2 + $0x10] sm:$0xff]  ;;  %v25_v1 = vld [vmem:[%s190_s2] sm:$0xff]  ;;  %101 = vset.pattern.permute.xlu1 %v126_v2  ;;  %100 = vset.pattern.permute.xlu0 %v126_v2 }
   0x2   :  { %42 = vperm.xlu1 %101, %v27_v0   ;;  %32 = vperm.xlu0 %100, %v25_v1  }
   0x3   :  { %9 = vsyncpa [#allocation5], 0  ;;  %v28_v3 = vld [vmem:[%s190_s2 + $0x18] sm:$0xff]  ;;  %v26_v4 = vld [vmem:[%s190_s2 + $0x8] sm:$0xff]  ;;  %v127_v5 = vmov 0.0   ;;  %vm70_vm0 = vcmask 1041409   ;;  %v80_v35 = vstv %s188_s0 }
   0x4   :  { %20 = vst [vmem:[#allocation2] sm:$0x3] %v127_v5  ;;  %v23_v8 = vld [vmem:[%s189_s1 + $0x10] sm:$0xff]  ;;  %v21_v9 = vld [vmem:[%s189_s1] sm:$0xff]  ;;  %v24_v10 = vld [vmem:[%s189_s1 + $0x18] sm:$0xff]  ;;  %s128_s28 = smov [#allocation4]  }
   0x5   :  { %v22_v11 = vld [vmem:[%s189_s1 + $0x8] sm:$0xff]  ;;  %s89_s29 = sshll.u32 %s128_s28, 4  ;;  %s90_s29 = int_to_ptr.vmem [resolvable:$true] %s89_s29 }
   0x6   :  { %47 = vperm.xlu1 %101, %v28_v3   ;;  %37 = vperm.xlu0 %100, %v26_v4   ;;  %s102_s30 = scalar_lea.vmem %s90_s29, 32  ;;  %p107_p1 = scmp.lt.s32.totalorder %s90_s29, %s90_s29 }
   0x7   :  { %p103_p0 = scmp.ne.s32.totalorder %s90_s29, %s102_s30  ;;  %p108_p2 = scmp.lt.s32.totalorder %s102_s30, %s102_s30 }
   0x9   :  { %p109_p3 = por %p108_p2, %p107_p1 }
   0xb   :  { %v29_v31 = vld [vmem:[#allocation2] sm:$0x3]  ;;  %p110_p4 = pnand %p109_p3, %p103_p0 }
  0x81   :  { %v43_v6 = vpop.permute.xlu1 %42  ;;  %v33_v7 = vpop.permute.xlu0 %32 }
  0x82   :  { %v52_v14 = vmul.f32 %v43_v6, %v23_v8  ;;  %v50_v15 = vmul.f32 %v33_v7, %v21_v9 }
  0x85   :  { %v48_v12 = vpop.permute.xlu1 %47  ;;  %v38_v13 = vpop.permute.xlu0 %37 }
  0x86   :  { %v53_v16 = vmul.f32 %v48_v12, %v24_v10  ;;  %v51_v17 = vmul.f32 %v38_v13, %v22_v11 }
  0x88   :  { %v61_v18 = vadd.f32 %v53_v16, %v52_v14  ;;  %v54_v19 = vadd.f32 %v51_v17, %v50_v15 }
  0x8a   :  { %v62_v20 = vrot.slane %v61_v18, 4  ;;  %v55_v21 = vrot.slane %v54_v19, 4 }
  0x8c   :  { %v63_v22 = vadd.f32 %v62_v20, %v61_v18  ;;  %v56_v23 = vadd.f32 %v55_v21, %v54_v19 }
  0x8e   :  { %v64_v24 = vrot.slane %v63_v22, 2  ;;  %v57_v25 = vrot.slane %v56_v23, 2 }
  0x90   :  { %v65_v26 = vadd.f32 %v64_v24, %v63_v22  ;;  %v58_v27 = vadd.f32 %v57_v25, %v56_v23 }
  0x92   :  { %v66_v28 = vrot.slane %v65_v26, 1  ;;  %v59_v29 = vrot.slane %v58_v27, 1 }
  0x94   :  { %v67_v30 = vadd.f32 %v66_v28, %v65_v26  ;;  %v60_v32 = vadd.f32 %v59_v29, %v58_v27 }
  0x96   :  { %v71_v33 = vsel %vm70_vm0, %v67_v30, %v60_v32 }
  0x97   :  { %v73_v34 = vadd.f32 %v71_v33, %v29_v31 }
  0x99   :  { %74 = vst [vmem:[#allocation2] sm:$0x3] %v73_v34 }
  0xa0   :  { %v78_v36 = vld [vmem:[#allocation2] sm:$0x3] }
  0xa1   :  { %v81_v37 = vmul.f32 %v80_v35, %v78_v36 }
  0xa3   :  { %82 = vst [vmem:[#allocation4] sm:$0x3] %v81_v37 }
  0xa4   :  { %113 = shalt.err (!%p110_p4)
}
  0xa5   :  { %s114_s6 = scalar_lea.hbm %s191_s3, 32 }
  0xa6   :  { %p115_p5 = scmp.ne.s32.totalorder %s191_s3, %s114_s6  ;;  %p118_p6 = scmp.lt.u32.totalorder %s114_s6, %s191_s3 }
  0xa8   :  { %p120_p7 = pnand %p118_p6, %p115_p5 }
  0xaa   :  { %123 = shalt.err (!%p120_p7)
}
  0xab   :  { %92 = dma.vmem_to_hbm [thread:$0]  %s90_s29, 32, %s191_s3, [#allocation5]  }
  0xac   :  { %124 = dma.done.wait [#allocation5], 32  }
  0xad   :  { %125 = vsyncadd [#allocation5], 4294967264 }
  0xae   :  { %96 = vsyncpa [#allocation5], 1 }

</bundles_post_ra>
